<compile_context>
chip_gen: v5e
topology: v5e:2x2
jax: 0.10.0
libtpu: 0.0.40
codegen_flags: <defaults>
</compile_context>

<pallas_src>
import jax
import jax.numpy as jnp
from jax.experimental import pallas as pl
from jax.experimental.pallas import tpu as pltpu


_LANES = 1024                          # lane-dense last dim: multiple of 128
_TARGET_TILE_BYTES = 2 * 1024 * 1024   # ~2 MiB/tile; 2 bufs x (in+out) ~ 8 MiB


def _copy_kernel(x_ref, o_ref):
    # Identity copy of one lane-dense tile.
    o_ref[...] = x_ref[...]


def _lane_dense_copy(x):
    """Bit-exact copy of `x` through a lane-dense, large-tile Pallas kernel."""
    orig_shape, dtype = x.shape, x.dtype
    n = x.size
    itemsize = jnp.dtype(dtype).itemsize

    # Rows of the flattened (rows, _LANES) view.
    rows_raw = pl.cdiv(n, _LANES)

    # Rows per tile: ~_TARGET_TILE_BYTES per buffer, multiple of 8 (sublane).
    tm = max(8, (_TARGET_TILE_BYTES // (_LANES * itemsize)) // 8 * 8)
    if rows_raw <= tm:
        # One tile covers everything; block dims equal full array dims,
        # so the (8, 128) divisibility rule does not apply.
        tm = rows_raw
        rows = rows_raw
    else:
        rows = pl.cdiv(rows_raw, tm) * tm  # pad rows to a multiple of tm

    padded_n = rows * _LANES
    flat = jnp.ravel(x)
    if padded_n != n:
        flat = jnp.pad(flat, (0, padded_n - n))
    flat2d = flat.reshape(rows, _LANES)

    tile_bytes = tm * _LANES * itemsize
    copied = pl.pallas_call(
        _copy_kernel,
        out_shape=jax.ShapeDtypeStruct((rows, _LANES), dtype),
        grid_spec=pltpu.PrefetchScalarGridSpec(
            num_scalar_prefetch=0,
            grid=(rows // tm,),
            in_specs=[pl.BlockSpec((tm, _LANES), lambda i: (i, 0))],
            out_specs=pl.BlockSpec((tm, _LANES), lambda i: (i, 0)),
        ),
        compiler_params=pltpu.CompilerParams(
            # Single axis marked parallel -> shards across the 2 TCs on v7x.
            dimension_semantics=("parallel",),
            # Room for double-buffered in+out tiles; stays <= 32 MiB so the
            # same setting is safe on v7x (64 MiB physical VMEM).
            vmem_limit_bytes=min(max(4 * tile_bytes + (1 << 20), 16 << 20),
                                 32 << 20),
        ),
        cost_estimate=pl.CostEstimate(
            flops=0,
            transcendentals=0,
            bytes_accessed=2 * padded_n * itemsize,
        ),
    )(flat2d)

    return copied.reshape(-1)[:n].reshape(orig_shape)


def extract_output_from_lstm(lstm_result, *, copy=False):
    """Pallas equivalent of ExtractOutputFromLSTM.forward.

    lstm_result: (out, (h_n, c_n)) with
        out : (seq_len, batch, hidden)
        h_n : (num_layers, batch, hidden)   -- ignored
        c_n : (num_layers, batch, hidden)   -- ignored

    Default path (`copy=False`) mirrors the module exactly: a zero-cost
    tuple extraction with no data movement.  `copy=True` routes through the
    lane-dense Pallas copy kernel when a distinct output buffer is needed.
    """
    out, (_h, _c) = lstm_result  # tuple destructuring == the module's forward
    if not copy:
        return out
    return _lane_dense_copy(out)


if __name__ == "__main__":
    # Small, LSTM-consistent shapes: seq=8, batch=2, hidden=32, num_layers=1.
    seq_len, batch, hidden, num_layers = 8, 2, 32, 1

    key = jax.random.PRNGKey(0)
    k_out, k_h, k_c = jax.random.split(key, 3)
    out = jax.random.normal(k_out, (seq_len, batch, hidden), dtype=jnp.float32)
    h_n = jax.random.normal(k_h, (num_layers, batch, hidden), dtype=jnp.float32)
    c_n = jax.random.normal(k_c, (num_layers, batch, hidden), dtype=jnp.float32)

    lstm_result = (out, (h_n, c_n))

    # Primary (optimized) path: zero-cost extraction, no kernel, no HBM traffic.
    fast = extract_output_from_lstm(lstm_result)
    jax.block_until_ready(fast)
    assert fast.shape == out.shape and fast.dtype == out.dtype
    assert bool(jnp.array_equal(fast, out))

    # Optional copy path: exercises the lane-dense Pallas copy kernel.
    copied = extract_output_from_lstm(lstm_result, copy=True)
    jax.block_until_ready(copied)
    assert copied.shape == out.shape and copied.dtype == out.dtype
    assert bool(jnp.array_equal(copied, out))

    print("KERNEL_OK")
</pallas_src>

<mosaic_0001>
module attributes {stable_mosaic.version = 11 : i64} {
  func.func @_copy_kernel(%arg0: i32, %arg1: memref<1x1024xf32, #tpu.memory_space<vmem>>, %arg2: memref<1x1024xf32, #tpu.memory_space<vmem>>) attributes {dimension_semantics = [#tpu.dimension_semantics<parallel>], iteration_bounds = array<i64: 1>, scalar_prefetch = 0 : i64, scratch_operands = 0 : i64, tpu.core_type = #tpu.core_type<tc>, window_params = [{transform_indices = @transform_0, window_bounds = array<i64: 1, 1024>}, {transform_indices = @transform_1, window_bounds = array<i64: 1, 1024>}]} {
    %c0 = arith.constant 0 : index
    %c0_0 = arith.constant 0 : index
    %0 = vector.load %arg1[%c0, %c0_0] : memref<1x1024xf32, #tpu.memory_space<vmem>>, vector<1x1024xf32>
    %c0_1 = arith.constant 0 : index
    %c0_2 = arith.constant 0 : index
    %1 = vector.load %arg2[%c0_1, %c0_2] : memref<1x1024xf32, #tpu.memory_space<vmem>>, vector<1x1024xf32>
    tpu.vector_store %arg2[%c0_1, %c0_2], %0 {strides = array<i32>} : memref<1x1024xf32, #tpu.memory_space<vmem>>, vector<1x1024xf32>,
    return
  }
  func.func @transform_0(%arg0: i32) -> (i32, i32) {
    %c0_i32 = arith.constant 0 : i32
    %c0_i32_0 = arith.constant 0 : i32
    return %arg0, %c0_i32 : i32, i32
  }
  func.func @transform_1(%arg0: i32) -> (i32, i32) {
    %c0_i32 = arith.constant 0 : i32
    %c0_i32_0 = arith.constant 0 : i32
    return %arg0, %c0_i32 : i32, i32
  }
}

</mosaic_0001>

<bundles_post_ra>
// kernel: tpu_custom_call.1
= control target key start
LH: loop header
LB: loop body
LE: loop exit
PB: predicated region body
PF: predicated region fallthrough
CT: control target
= control target key end

     0   :  { %6 = vsyncpa [#allocation3], 0  ;;  %s114_s0 = inlined_call_operand.hbm [shape: f32[1,1024], index: 0, kind: input, shape index: {}]   ;;  %s115_s1 = inlined_call_operand.hbm [shape: f32[1,1024], index: 1, kind: output, shape index: {}]  }
   0x1   :  { %7 = vsyncpa [#allocation4], 0  ;;  %s13_s8 = sshll.u32 %s114_s0, 4  ;;  %s96_s9 = smov [#allocation2]   ;;  %s14_s8 = int_to_ptr.hbm [resolvable:$true] %s13_s8 }
   0x2   :  { %s15_s10 = sshll.u32 %s96_s9, 4  ;;  %s16_s10 = int_to_ptr.vmem [resolvable:$true] %s15_s10 }
   0x3   :  { %18 = dma.hbm_to_vmem [thread:$0]  %s14_s8, 128, %s16_s10, [#allocation3]  }
   0x4   :  { %92 = dma.done.wait [#allocation3], 128  }
   0x5   :  { %93 = vsyncadd [#allocation3], 4294967168  ;;  %s97_s11 = smov [#allocation5]   ;;  %s32_s15 = sshll.u32 %s115_s1, 4  ;;  %v23_v0 = vld [vmem:[#allocation2] sm:$0xff]  ;;  %s33_s15 = int_to_ptr.hbm [resolvable:$true] %s32_s15 }
   0x6   :  { %s30_s12 = sshll.u32 %s97_s11, 4  ;;  %24 = vst [vmem:[#allocation5] sm:$0xff] %v23_v0  ;;  %s31_s12 = int_to_ptr.vmem [resolvable:$true] %s30_s12 }
   0x7   :  { %35 = dma.vmem_to_hbm [thread:$0]  %s31_s12, 128, %s33_s15, [#allocation4]  }
   0x8   :  { %94 = dma.done.wait [#allocation4], 128  }
   0x9   :  { %95 = vsyncadd [#allocation4], 4294967168 }
   0xa   :  { %40 = vsyncpa [#allocation3], 1 }
   0xb   :  { %41 = vsyncpa [#allocation4], 1 }

</bundles_post_ra>
